<compile_context>
chip_gen: v5e
topology: v5e:2x2
jax: 0.10.0
libtpu: 0.0.40
codegen_flags: <defaults>
</compile_context>

<pallas_src>
import functools
import math

import jax
import jax.numpy as jnp
from jax.experimental import pallas as pl
from jax.experimental.pallas import tpu as pltpu


_MAX_TILE_B = 512   # 1024-row tiles make the (feat, rows) f32 intermediates eat
                    # the vreg file / VMEM; 512 is the measured sweet spot.


def _cdiv(a: int, b: int) -> int:
    return (a + b - 1) // b


def _round_up(x: int, m: int) -> int:
    return _cdiv(x, m) * m


def _choose_tile_b(batch: int) -> int:
    """Rows handled per grid step."""
    if batch <= 256:
        # Single tile: block == full array (no (8,128) rounding needed) and the
        # per-step overhead of splitting is not worth it at this size.
        return batch
    if batch <= 2 * _MAX_TILE_B:
        # Keep >= 2 grid steps so v7x's two TensorCores both get work.
        # Multiple of 128 keeps the lane-dense output block legal when the
        # last grid block is ragged.
        return _round_up(_cdiv(batch, 2), 128)
    return _MAX_TILE_B


def _apply_activation(h, act):
    if act == "relu":
        return jnp.maximum(h, 0.0)
    if act == "tanh":
        return jnp.tanh(h)                       # EUP
    if act == "sigmoid":
        # Stable, EUP-only form: sigmoid(x) = 0.5 * (tanh(x/2) + 1).
        return 0.5 * (jnp.tanh(0.5 * h) + 1.0)
    return h                                     # None -> identity


def _fused_mlp_kernel(*refs, activations, compute_dtype):
    """Whole MLP forward for one batch tile, computed feature-major.

    refs = (x_ref, w0, b0, w1, b1, ..., o_ref)
      x_ref : (tile_b, in0)        batch-major input tile
      w_i   : (out_i, in_i)        native PyTorch orientation, VMEM-resident
      b_i   : (out_i, 1)           column bias, VMEM-resident
      o_ref : (out_last, tile_b)   lane-dense: rows live on the 128-lane axis
    Intermediates stay in vregs/VMEM; only o_ref is written back to HBM.
    """
    x_ref = refs[0]
    o_ref = refs[-1]
    layer_refs = refs[1:-1]

    x = x_ref[...]
    if compute_dtype != jnp.float32:
        x = x.astype(compute_dtype)

    # Layer 0: contract the shared `in` dim of W (o,i) and x (b,i) -> (o,b).
    # Same A @ B^T dot_general pattern the MXU runs for attention's q @ k^T.
    w0 = layer_refs[0][...]
    b0 = layer_refs[1][...]
    h = jnp.einsum("oi,bi->ob", w0, x,
                   preferred_element_type=jnp.float32) + b0
    h = _apply_activation(h, activations[0])

    # Remaining layers: plain (out,in) @ (in,rows) MXU matmuls, f32 accumulate.
    for i in range(1, len(activations)):
        w = layer_refs[2 * i][...]
        b = layer_refs[2 * i + 1][...]
        hm = h if compute_dtype == jnp.float32 else h.astype(compute_dtype)
        h = jnp.dot(w, hm, preferred_element_type=jnp.float32) + b
        h = _apply_activation(h, activations[i])

    # Single lane-dense HBM store: out_last sublanes x tile_b lanes, unmasked.
    o_ref[...] = h.astype(o_ref.dtype)


@functools.partial(jax.jit, static_argnames=("activations", "compute_dtype"))
def fused_mlp_forward(x, params, activations, compute_dtype=jnp.float32):
    """x: (B, in0) f32.  params: tuple of (w (out,in), b (out,1)).

    Returns (B, out_last) f32.
    """
    B, in0 = x.shape
    out_f = params[-1][0].shape[0]

    tile_b = _choose_tile_b(B)
    grid = (_cdiv(B, tile_b),)   # ragged last block handled by Pallas; safe
                                 # because all ops are row-independent.

    flat_params = []
    for w, b in params:
        flat_params.append(w)
        flat_params.append(b)

    in_specs = [pl.BlockSpec((tile_b, in0), lambda i: (i, 0))]
    for p in flat_params:
        # Constant index_map: weight/bias block is VMEM-resident for the grid.
        in_specs.append(pl.BlockSpec(p.shape, lambda i: (0, 0)))
    # Lane-dense output block: batch rows on the 128-lane axis.
    out_specs = pl.BlockSpec((out_f, tile_b), lambda i: (0, i))

    # Advisory cost estimate (actual byte widths / transcendental counts).
    flops = 0
    transcendentals = 0
    bytes_accessed = x.size * x.dtype.itemsize + B * out_f * 4
    for (w, b), act in zip(params, activations):
        o, i_ = w.shape
        flops += 2 * B * i_ * o + B * o
        if act in ("tanh", "sigmoid"):
            transcendentals += B * o
        bytes_accessed += w.size * w.dtype.itemsize + b.size * b.dtype.itemsize

    # Resident VMEM footprint: double-buffered x/out tiles, (double-buffered)
    # resident weights, plus a few live intermediates.  Only raise the scoped
    # limit when the default would not fit (matters for big `sizes` on v7x's
    # 64 MiB VMEM).
    # TODO(synk): for very large weight sets, single-buffer the resident weight
    # blocks (pl.Buffered(1) pipeline_mode) to halve their VMEM footprint.
    max_feat = max(max(w.shape) for w, _ in params)
    footprint = (
        2 * (tile_b * in0 * x.dtype.itemsize + out_f * tile_b * 4)
        + 2 * sum(w.size * w.dtype.itemsize + b.size * b.dtype.itemsize
                  for w, b in params)
        + 3 * max_feat * tile_b * 4)
    cp_kwargs = dict(dimension_semantics=("parallel",))
    if footprint > (12 << 20):
        cp_kwargs["vmem_limit_bytes"] = int(footprint * 1.5) + (2 << 20)

    kernel = functools.partial(
        _fused_mlp_kernel, activations=activations, compute_dtype=compute_dtype)

    out_t = pl.pallas_call(
        kernel,
        out_shape=jax.ShapeDtypeStruct((out_f, B), jnp.float32),
        grid=grid,
        in_specs=in_specs,
        out_specs=out_specs,
        compiler_params=pltpu.CompilerParams(**cp_kwargs),
        cost_estimate=pl.CostEstimate(
            flops=flops,
            transcendentals=transcendentals,
            bytes_accessed=bytes_accessed),
    )(x, *flat_params)

    # Only wrapper-side fix-up: transpose the tiny (out_f, B) result back to
    # batch-major (out_f is usually 1-8 for this regressor -> a few KB).
    return out_t.T


class FnPallas:
    """JAX/Pallas port of the Fn MLP regressor forward pass.

    Mirrors Fn.__init__'s layer construction: for each consecutive pair in
    `sizes`, a Linear followed by an optional activation from
    {'sigmoid', 'tanh', 'relu'}.
    """
    # TODO(synk): loss functions, optimizers and the fit/train/test loops of
    # the PyTorch module are training utilities out of scope for this forward
    # kernel (as are FnDataset / generate_dataset / DataLoader plumbing).

    ACTIVATIONS = {"sigmoid", "tanh", "relu"}

    def __init__(self, sizes, activations, key, compute_dtype=jnp.float32):
        if len(sizes) < len(activations):
            raise ValueError("Cannot have null layers with activation functions!")
        activations = list(activations) + [None] * (len(sizes) - len(activations))
        if any(a is not None and str(a).lower() not in self.ACTIVATIONS
               for a in activations):
            raise ValueError("Invalid activation function list")
        # NOTE: keep compute_dtype=float32 on v5e (no bf16 VPU/EUP support);
        # bf16 is only worth it for genuinely large layer widths on v6e/v7x.
        params, acts = [], []
        for i in range(len(sizes) - 1):
            in_f, out_f = sizes[i], sizes[i + 1]
            act = activations[i].lower() if activations[i] else None
            key, kw, kb = jax.random.split(key, 3)
            # PyTorch nn.Linear default init: U(-1/sqrt(in), 1/sqrt(in)),
            # native (out, in) orientation — consumed directly by the kernel.
            bound = 1.0 / math.sqrt(in_f)
            w = jax.random.uniform(kw, (out_f, in_f), jnp.float32, -bound, bound)
            b = jax.random.uniform(kb, (out_f,), jnp.float32, -bound, bound)
            # Pre-cast ONCE here if a low-precision MXU path is requested:
            # halves weight DMA and removes per-step casts of resident data.
            params.append((w.astype(compute_dtype), b.reshape(out_f, 1)))
            acts.append(act)
        self.params = tuple(params)
        self.activations = tuple(acts)
        self.compute_dtype = compute_dtype

    def __call__(self, x):
        x = jnp.asarray(x, jnp.float32)
        squeeze = x.ndim == 1
        if squeeze:                      # mirror Fn.forward's single-sample use
            x = x[None, :]
        out = fused_mlp_forward(x, self.params, self.activations,
                                self.compute_dtype)
        return out[0] if squeeze else out


def _reference_forward(model, x):
    """Pure-JAX reference for a sanity check."""
    for (w, b), act in zip(model.params, model.activations):
        x = x @ w.astype(jnp.float32).T + b[:, 0]
        if act == "relu":
            x = jnp.maximum(x, 0.0)
        elif act == "tanh":
            x = jnp.tanh(x)
        elif act == "sigmoid":
            x = jax.nn.sigmoid(x)
    return x


if __name__ == "__main__":
    key = jax.random.PRNGKey(0)
    key, kx, kp = jax.random.split(key, 3)

    # MLP: sizes=[32, 64, 64, 8]; all three supported activations exercised.
    sizes = [32, 64, 64, 8]
    activations = ["relu", "tanh", "sigmoid"]
    model = FnPallas(sizes, activations, kp)

    # Small batch: single fused launch, grid=(1,), blocks == full arrays.
    batch = 8
    x = jax.random.normal(kx, (batch, sizes[0]), dtype=jnp.float32)
    out = jax.block_until_ready(model(x))
    ref = _reference_forward(model, x)
    assert out.shape == (batch, sizes[-1]), out.shape
    assert jnp.allclose(out, ref, atol=1e-5, rtol=1e-5), \
        "mismatch vs reference (small batch)"

    # Batch that is neither a multiple of the tile nor of 8: exercises the
    # two-step parallel grid with a ragged last block (no wrapper pad/slice).
    key, kx2 = jax.random.split(key)
    batch2 = 300
    x2 = jax.random.normal(kx2, (batch2, sizes[0]), dtype=jnp.float32)
    out2 = jax.block_until_ready(model(x2))
    ref2 = _reference_forward(model, x2)
    assert out2.shape == (batch2, sizes[-1]), out2.shape
    assert jnp.allclose(out2, ref2, atol=1e-5, rtol=1e-5), \
        "mismatch vs reference (tiled batch)"

    print("KERNEL_OK")
</pallas_src>

<mosaic_0001>
module attributes {stable_mosaic.version = 11 : i64} {
  func.func @_fused_mlp_kernel(%arg0: i32, %arg1: memref<8x32xf32, #tpu.memory_space<vmem>>, %arg2: memref<64x32xf32, #tpu.memory_space<vmem>>, %arg3: memref<64x1xf32, #tpu.memory_space<vmem>>, %arg4: memref<64x64xf32, #tpu.memory_space<vmem>>, %arg5: memref<64x1xf32, #tpu.memory_space<vmem>>, %arg6: memref<8x64xf32, #tpu.memory_space<vmem>>, %arg7: memref<8x1xf32, #tpu.memory_space<vmem>>, %arg8: memref<8x8xf32, #tpu.memory_space<vmem>>) attributes {dimension_semantics = [#tpu.dimension_semantics<parallel>], iteration_bounds = array<i64: 1>, scalar_prefetch = 0 : i64, scratch_operands = 0 : i64, tpu.core_type = #tpu.core_type<tc>, window_params = [{transform_indices = @transform_0, window_bounds = array<i64: 8, 32>}, {pipeline_mode = #tpu.pipeline_mode<synchronous>, transform_indices = @transform_1, window_bounds = array<i64: 64, 32>}, {pipeline_mode = #tpu.pipeline_mode<synchronous>, transform_indices = @transform_2, window_bounds = array<i64: 64, 1>}, {pipeline_mode = #tpu.pipeline_mode<synchronous>, transform_indices = @transform_3, window_bounds = array<i64: 64, 64>}, {pipeline_mode = #tpu.pipeline_mode<synchronous>, transform_indices = @transform_4, window_bounds = array<i64: 64, 1>}, {pipeline_mode = #tpu.pipeline_mode<synchronous>, transform_indices = @transform_5, window_bounds = array<i64: 8, 64>}, {pipeline_mode = #tpu.pipeline_mode<synchronous>, transform_indices = @transform_6, window_bounds = array<i64: 8, 1>}, {transform_indices = @transform_7, window_bounds = array<i64: 8, 8>}]} {
    %c0 = arith.constant 0 : index
    %c0_0 = arith.constant 0 : index
    %0 = vector.load %arg1[%c0, %c0_0] : memref<8x32xf32, #tpu.memory_space<vmem>>, vector<8x32xf32>
    %c0_1 = arith.constant 0 : index
    %c0_2 = arith.constant 0 : index
    %1 = vector.load %arg2[%c0_1, %c0_2] : memref<64x32xf32, #tpu.memory_space<vmem>>, vector<64x32xf32>
    %c0_3 = arith.constant 0 : index
    %c0_4 = arith.constant 0 : index
    %2 = vector.load %arg3[%c0_3, %c0_4] : memref<64x1xf32, #tpu.memory_space<vmem>>, vector<64x1xf32>
    "tpu.trace_start"() <{level = 10 : i32, message = "oi,bi->ob"}> : () -> ()
    %cst = arith.constant dense<0.000000e+00> : vector<64x8xf32>
    %3 = tpu.matmul %1, %0, %cst {dimension_numbers = #tpu.dot_dimension_numbers<[1], [1], [0], [0], [0, 0, 1, 0], [], []>} : vector<64x32xf32>, vector<8x32xf32>, vector<64x8xf32> -> vector<64x8xf32>
    "tpu.trace_stop"() : () -> ()
    %4 = vector.broadcast %2 : vector<64x1xf32> to vector<64x8xf32>
    %5 = arith.addf %3, %4 : vector<64x8xf32>
    %cst_5 = arith.constant 0.000000e+00 : f32
    %6 = vector.broadcast %cst_5 : f32 to vector<64x8xf32>
    %7 = arith.maximumf %5, %6 : vector<64x8xf32>
    %c0_6 = arith.constant 0 : index
    %c0_7 = arith.constant 0 : index
    %8 = vector.load %arg4[%c0_6, %c0_7] : memref<64x64xf32, #tpu.memory_space<vmem>>, vector<64x64xf32>
    %c0_8 = arith.constant 0 : index
    %c0_9 = arith.constant 0 : index
    %9 = vector.load %arg5[%c0_8, %c0_9] : memref<64x1xf32, #tpu.memory_space<vmem>>, vector<64x1xf32>
    %cst_10 = arith.constant dense<0.000000e+00> : vector<64x8xf32>
    %10 = tpu.matmul %8, %7, %cst_10 {dimension_numbers = #tpu.dot_dimension_numbers<[1], [0], [0], [1], [0, 0, 1, 1], [], []>} : vector<64x64xf32>, vector<64x8xf32>, vector<64x8xf32> -> vector<64x8xf32>
    %11 = vector.broadcast %9 : vector<64x1xf32> to vector<64x8xf32>
    %12 = arith.addf %10, %11 : vector<64x8xf32>
    %13 = math.tanh %12 : vector<64x8xf32>
    %c0_11 = arith.constant 0 : index
    %c0_12 = arith.constant 0 : index
    %14 = vector.load %arg6[%c0_11, %c0_12] : memref<8x64xf32, #tpu.memory_space<vmem>>, vector<8x64xf32>
    %c0_13 = arith.constant 0 : index
    %c0_14 = arith.constant 0 : index
    %15 = vector.load %arg7[%c0_13, %c0_14] : memref<8x1xf32, #tpu.memory_space<vmem>>, vector<8x1xf32>
    %cst_15 = arith.constant dense<0.000000e+00> : vector<8x8xf32>
    %16 = tpu.matmul %14, %13, %cst_15 {dimension_numbers = #tpu.dot_dimension_numbers<[1], [0], [0], [1], [0, 0, 1, 1], [], []>} : vector<8x64xf32>, vector<64x8xf32>, vector<8x8xf32> -> vector<8x8xf32>
    %17 = vector.broadcast %15 : vector<8x1xf32> to vector<8x8xf32>
    %18 = arith.addf %16, %17 : vector<8x8xf32>
    %cst_16 = arith.constant 5.000000e-01 : f32
    %19 = vector.broadcast %cst_16 : f32 to vector<8x8xf32>
    %20 = arith.mulf %19, %18 : vector<8x8xf32>
    %21 = math.tanh %20 : vector<8x8xf32>
    %cst_17 = arith.constant 1.000000e+00 : f32
    %22 = vector.broadcast %cst_17 : f32 to vector<8x8xf32>
    %23 = arith.addf %21, %22 : vector<8x8xf32>
    %cst_18 = arith.constant 5.000000e-01 : f32
    %24 = vector.broadcast %cst_18 : f32 to vector<8x8xf32>
    %25 = arith.mulf %24, %23 : vector<8x8xf32>
    %c0_19 = arith.constant 0 : index
    %c0_20 = arith.constant 0 : index
    %26 = vector.load %arg8[%c0_19, %c0_20] : memref<8x8xf32, #tpu.memory_space<vmem>>, vector<8x8xf32>
    tpu.vector_store %arg8[%c0_19, %c0_20], %25 {strides = array<i32>} : memref<8x8xf32, #tpu.memory_space<vmem>>, vector<8x8xf32>,
    return
  }
  func.func @transform_0(%arg0: i32) -> (i32, i32) {
    %c0_i32 = arith.constant 0 : i32
    %c0_i32_0 = arith.constant 0 : i32
    return %arg0, %c0_i32 : i32, i32
  }
  func.func @transform_1(%arg0: i32) -> (i32, i32) {
    %c0_i32 = arith.constant 0 : i32
    %c0_i32_0 = arith.constant 0 : i32
    %c0_i32_1 = arith.constant 0 : i32
    return %c0_i32, %c0_i32_0 : i32, i32
  }
  func.func @transform_2(%arg0: i32) -> (i32, i32) {
    %c0_i32 = arith.constant 0 : i32
    %c0_i32_0 = arith.constant 0 : i32
    %c0_i32_1 = arith.constant 0 : i32
    return %c0_i32, %c0_i32_0 : i32, i32
  }
  func.func @transform_3(%arg0: i32) -> (i32, i32) {
    %c0_i32 = arith.constant 0 : i32
    %c0_i32_0 = arith.constant 0 : i32
    %c0_i32_1 = arith.constant 0 : i32
    return %c0_i32, %c0_i32_0 : i32, i32
  }
  func.func @transform_4(%arg0: i32) -> (i32, i32) {
    %c0_i32 = arith.constant 0 : i32
    %c0_i32_0 = arith.constant 0 : i32
    %c0_i32_1 = arith.constant 0 : i32
    return %c0_i32, %c0_i32_0 : i32, i32
  }
  func.func @transform_5(%arg0: i32) -> (i32, i32) {
    %c0_i32 = arith.constant 0 : i32
    %c0_i32_0 = arith.constant 0 : i32
    %c0_i32_1 = arith.constant 0 : i32
    return %c0_i32, %c0_i32_0 : i32, i32
  }
  func.func @transform_6(%arg0: i32) -> (i32, i32) {
    %c0_i32 = arith.constant 0 : i32
    %c0_i32_0 = arith.constant 0 : i32
    %c0_i32_1 = arith.constant 0 : i32
    return %c0_i32, %c0_i32_0 : i32, i32
  }
  func.func @transform_7(%arg0: i32) -> (i32, i32) {
    %c0_i32 = arith.constant 0 : i32
    %c0_i32_0 = arith.constant 0 : i32
    return %c0_i32, %arg0 : i32, i32
  }
}

</mosaic_0001>

<bundles_post_ra>
// kernel: fused_mlp_forward.1
= control target key start
LH: loop header
LB: loop body
LE: loop exit
PB: predicated region body
PF: predicated region fallthrough
CT: control target
= control target key end

     0   :  { %vm83_vm0 = vcmask 261120   ;;  %v379_v0 = vmov 0   ;;  %vm216_vm1 = vcmask 523264   ;;  %vm324_vm2 = vcmask 64512   ;;  %s547_s2 = inlined_call_operand.vmem [shape: f32[64,1], index: 2, kind: input, shape index: {}]   ;;  %s548_s0 = inlined_call_operand.vmem [shape: f32[8,32], index: 0, kind: input, shape index: {}]   ;;  %s549_s1 = inlined_call_operand.vmem [shape: f32[64,32], index: 1, kind: input, shape index: {}]   ;;  %s550_s4 = inlined_call_operand.vmem [shape: f32[64,1], index: 4, kind: input, shape index: {}]   ;;  %s551_s6 = inlined_call_operand.vmem [shape: f32[8,1], index: 6, kind: input, shape index: {}]   ;;  %s552_s3 = inlined_call_operand.vmem [shape: f32[64,64], index: 3, kind: input, shape index: {}]   ;;  %s553_s5 = inlined_call_operand.vmem [shape: f32[8,64], index: 5, kind: input, shape index: {}]   ;;  %s554_s7 = inlined_call_operand.vmem [shape: f32[8,8], index: 7, kind: output, shape index: {}]  }
   0x1   :  { %359 = vset.pattern.permute.xlu1 %v379_v0  ;;  %358 = vset.pattern.permute.xlu0 %v379_v0  ;;  %v42_v1 = vld [vmem:[%s547_s2 + $0x38] sm:$0xff]  ;;  %v40_v2 = vld [vmem:[%s547_s2 + $0x28] sm:$0xff]  ;;  %v26_v3 = vld [vmem:[%s548_s0] sm:$0xff] }
   0x2   :  { %80 = vperm.xlu0 %358, %v42_v1   ;;  %70 = vperm.xlu1 %359, %v40_v2   ;;  %v27_v4 = vld [vmem:[%s549_s1] sm:$0xff]  ;;  %v32_v5 = vld [vmem:[%s549_s1 + $0x28] sm:$0xff]  ;;  %v41_v6 = vld [vmem:[%s547_s2 + $0x30] sm:$0xff] }
   0x3   :  { %330 = vmatpush.xpose.msk.msra.mxu0 %vm83_vm0, %v26_v3  ;;  %348 = vmatpush.xpose.msk.msra.mxu2 %vm83_vm0, %v26_v3  ;;  %v39_v7 = vld [vmem:[%s547_s2 + $0x20] sm:$0xff]  ;;  %v38_v8 = vld [vmem:[%s547_s2 + $0x18] sm:$0xff]  ;;  %v28_v9 = vld [vmem:[%s549_s1 + $0x8] sm:$0xff] }
   0x4   :  { %360 = vset.pattern.permute.xlu2 %v379_v0  ;;  %v33_v10 = vld [vmem:[%s549_s1 + $0x30] sm:$0xff]  ;;  %v36_v12 = vld [vmem:[%s547_s2 + $0x8] sm:$0xff]  ;;  %v35_v13 = vld [vmem:[%s547_s2] sm:$0xff] }
   0x5   :  { %60 = vperm.xlu2 %360, %v38_v8   ;;  %v37_v11 = vld [vmem:[%s547_s2 + $0x10] sm:$0xff]  ;;  %v34_v15 = vld [vmem:[%s549_s1 + $0x38] sm:$0xff]  ;;  %v173_v18 = vld [vmem:[%s550_s4 + $0x28] sm:$0xff] }
   0x6   :  { %331 = vmatmul.msk.f32.vlgmr.msra.gmra.mxu0 %vm83_vm0, %v27_v4  ;;  %336 = vmatmul.msk.f32.vlgmr.msra.gmra.mxu2 %vm83_vm0, %v32_v5  ;;  %v29_v14 = vld [vmem:[%s549_s1 + $0x10] sm:$0xff]  ;;  %v175_v16 = vld [vmem:[%s550_s4 + $0x38] sm:$0xff]  ;;  %v172_v20 = vld [vmem:[%s550_s4 + $0x20] sm:$0xff] }
   0x7   :  { %v174_v17 = vld [vmem:[%s550_s4 + $0x30] sm:$0xff]  ;;  %v30_v19 = vld [vmem:[%s549_s1 + $0x18] sm:$0xff]  ;;  %v31_v23 = vld [vmem:[%s549_s1 + $0x20] sm:$0xff] }
   0x8   :  { %v171_v21 = vld [vmem:[%s550_s4 + $0x18] sm:$0xff]  ;;  %v170_v22 = vld [vmem:[%s550_s4 + $0x10] sm:$0xff]  ;;  %v169_v24 = vld [vmem:[%s550_s4 + $0x8] sm:$0xff] }
   0x9   :  { %v168_v25 = vld [vmem:[%s550_s4] sm:$0xff]  ;;  %v161_v61 = vld [vmem:[%s552_s3 + $0x8] sm:$0xff]  ;;  %v162_v63 = vld [vmem:[%s552_s3 + $0x10] sm:$0xff] }
   0xa   :  { %75 = vperm.xlu0 %358, %v41_v6   ;;  %65 = vperm.xlu1 %359, %v39_v7   ;;  %v291_v26 = vld [vmem:[%s551_s6] sm:$0xff]  ;;  %v165_v62 = vld [vmem:[%s552_s3 + $0x28] sm:$0xff]  ;;  %v166_v0 = vld [vmem:[%s552_s3 + $0x30] sm:$0xff] }
   0xb   :  { %v160_v59 = vld [vmem:[%s552_s3] sm:$0xff]  ;;  %v163_v1 = vld [vmem:[%s552_s3 + $0x18] sm:$0xff] }
   0xc   :  { %v164_v60 = vld [vmem:[%s552_s3 + $0x20] sm:$0xff]  ;;  %v167_v2 = vld [vmem:[%s552_s3 + $0x38] sm:$0xff] }
   0xd   :  { %55 = vperm.xlu2 %360, %v37_v11  }
   0xe   :  { %332 = vmatmul.msk.f32.gmra.mxu0 %vm83_vm0, %v28_v9  ;;  %337 = vmatmul.msk.f32.gmra.mxu2 %vm83_vm0, %v33_v10 }
  0x12   :  { %50 = vperm.xlu0 %358, %v36_v12   ;;  %45 = vperm.xlu1 %359, %v35_v13  }
  0x15   :  { %213 = vperm.xlu2 %360, %v175_v16  }
  0x16   :  { %333 = vmatmul.msk.f32.gmra.mxu0 %vm83_vm0, %v29_v14  ;;  %338 = vmatmul.msk.f32.gmra.mxu2 %vm83_vm0, %v34_v15 }
  0x1a   :  { %208 = vperm.xlu0 %358, %v174_v17   ;;  %203 = vperm.xlu1 %359, %v173_v18  }
  0x1d   :  { %198 = vperm.xlu2 %360, %v172_v20  }
  0x1e   :  { %334 = vmatmul.msk.f32.gmra.mxu0 %vm83_vm0, %v30_v19 }
  0x22   :  { %193 = vperm.xlu0 %358, %v171_v21   ;;  %188 = vperm.xlu1 %359, %v170_v22  }
  0x25   :  { %183 = vperm.xlu2 %360, %v169_v24  }
  0x26   :  { %335 = vmatmul.msk.f32.gmra.mxu0 %vm83_vm0, %v31_v23 }
  0x2a   :  { %178 = vperm.xlu0 %358, %v168_v25   ;;  %294 = vperm.xlu1 %359, %v291_v26  }
  0x5f   :  { %v61_v38 = vpop.permute.xlu2 %60 }
  0x67   :  { %v56_v48 = vpop.permute.xlu2 %55 }
  0x6f   :  { %v214_v7 = vpop.permute.xlu2 %213 }
  0x74   :  { %v81_v30 = vpop.permute.xlu0 %80  ;;  %v71_v32 = vpop.permute.xlu1 %70 }
  0x77   :  { %v199_v12 = vpop.permute.xlu2 %198 }
  0x7c   :  { %v76_v34 = vpop.permute.xlu0 %75  ;;  %v66_v42 = vpop.permute.xlu1 %65 }
  0x7f   :  { %v184_v24 = vpop.permute.xlu2 %183 }
  0x83   :  { %v128_v27 = vpop.f32.mrf.mxu0 }
  0x84   :  { %v51_v51 = vpop.permute.xlu0 %50  ;;  %v46_v52 = vpop.permute.xlu1 %45 }
  0x85   :  { %v129_v55 = vadd.f32 %v128_v27, %v46_v52 }
  0x87   :  { %v152_v58 = vmax.f32 %v129_v55, 0.0 }
  0x89   :  { %v143_v28 = vpop.f32.mrf.mxu2 }
  0x8a   :  { %v144_v40 = vadd.f32 %v143_v28, %v71_v32 }
  0x8b   :  { %v131_v29 = vpop.f32.mrf.mxu0 }
  0x8c   :  { %v157_v44 = vmax.f32 %v144_v40, 0.0  ;;  %v132_v53 = vadd.f32 %v131_v29, %v51_v51  ;;  %v209_v8 = vpop.permute.xlu0 %208  ;;  %v204_v11 = vpop.permute.xlu1 %203 }
  0x8e   :  { %v153_v57 = vmax.f32 %v132_v53, 0.0 }
  0x91   :  { %v146_v31 = vpop.f32.mrf.mxu2 }
  0x92   :  { %v147_v36 = vadd.f32 %v146_v31, %v76_v34  ;;  %v290_v34 = vld [vmem:[%s553_s5] sm:$0xff] }
  0x93   :  { %v134_v33 = vpop.f32.mrf.mxu0 }
  0x94   :  { %v158_v43 = vmax.f32 %v147_v36, 0.0  ;;  %v135_v49 = vadd.f32 %v134_v33, %v56_v48  ;;  %v194_v16 = vpop.permute.xlu0 %193  ;;  %v189_v21 = vpop.permute.xlu1 %188 }
  0x96   :  { %v154_v56 = vmax.f32 %v135_v49, 0.0 }
  0x99   :  { %v149_v35 = vpop.f32.mrf.mxu2 }
  0x9a   :  { %v150_v37 = vadd.f32 %v149_v35, %v81_v30 }
  0x9b   :  { %v137_v39 = vpop.f32.mrf.mxu0 }
  0x9c   :  { %v159_v41 = vmax.f32 %v150_v37, 0.0  ;;  %v138_v46 = vadd.f32 %v137_v39, %v61_v38  ;;  %v179_v27 = vpop.permute.xlu0 %178  ;;  %v295_v36 = vpop.permute.xlu1 %294 }
  0x9e   :  { %249 = vmatpush.msra.mxu1 %v159_v41  ;;  %349 = vmatpush.msra.mxu3 %v159_v41  ;;  %v155_v54 = vmax.f32 %v138_v46, 0.0 }
  0xa0   :  { %250 = vmatpush.msra.mxu1 %v158_v43  ;;  %350 = vmatpush.msra.mxu3 %v158_v43 }
  0xa2   :  { %251 = vmatpush.msra.mxu1 %v157_v44  ;;  %351 = vmatpush.msra.mxu3 %v157_v44 }
  0xa3   :  { %v140_v45 = vpop.f32.mrf.mxu0 }
  0xa4   :  { %v141_v47 = vadd.f32 %v140_v45, %v66_v42 }
  0xa6   :  { %v156_v50 = vmax.f32 %v141_v47, 0.0 }
  0xa8   :  { %252 = vmatpush.msra.mxu1 %v156_v50  ;;  %352 = vmatpush.msra.mxu3 %v156_v50 }
  0xaa   :  { %253 = vmatpush.msra.mxu1 %v155_v54  ;;  %353 = vmatpush.msra.mxu3 %v155_v54 }
  0xac   :  { %254 = vmatpush.msra.mxu1 %v154_v56  ;;  %354 = vmatpush.msra.mxu3 %v154_v56 }
  0xae   :  { %255 = vmatpush.msra.mxu1 %v153_v57  ;;  %355 = vmatpush.msra.mxu3 %v153_v57 }
  0xb0   :  { %256 = vmatpush.msra.mxu1 %v152_v58  ;;  %356 = vmatpush.msra.mxu3 %v152_v58 }
  0xb1   :  { %339 = vmatmul.msk.f32.vlgmr.msra.gmra.mxu1 %vm216_vm1, %v160_v59  ;;  %343 = vmatmul.msk.f32.vlgmr.msra.gmra.mxu3 %vm216_vm1, %v164_v60 }
  0xb9   :  { %340 = vmatmul.msk.f32.gmra.mxu1 %vm216_vm1, %v161_v61  ;;  %344 = vmatmul.msk.f32.gmra.mxu3 %vm216_vm1, %v165_v62 }
  0xc1   :  { %341 = vmatmul.msk.f32.gmra.mxu1 %vm216_vm1, %v162_v63  ;;  %345 = vmatmul.msk.f32.gmra.mxu3 %vm216_vm1, %v166_v0 }
  0xc9   :  { %342 = vmatmul.msk.f32.gmra.mxu1 %vm216_vm1, %v163_v1  ;;  %346 = vmatmul.msk.f32.gmra.mxu3 %vm216_vm1, %v167_v2 }
 0x12e   :  { %v258_v3 = vpop.f32.mrf.mxu1 }
 0x12f   :  { %v259_v29 = vadd.f32 %v258_v3, %v179_v27 }
 0x134   :  { %v270_v4 = vpop.f32.mrf.mxu3 }
 0x135   :  { %v271_v19 = vadd.f32 %v270_v4, %v199_v12 }
 0x136   :  { %v261_v5 = vpop.f32.mrf.mxu1 }
 0x137   :  { %v262_v26 = vadd.f32 %v261_v5, %v184_v24 }
 0x13c   :  { %v273_v6 = vpop.f32.mrf.mxu3 }
 0x13d   :  { %v274_v17 = vadd.f32 %v273_v6, %v204_v11 }
 0x13e   :  { %v264_v10 = vpop.f32.mrf.mxu1 }
 0x13f   :  { %v265_v23 = vadd.f32 %v264_v10, %v189_v21 }
 0x144   :  { %v276_v9 = vpop.f32.mrf.mxu3 }
 0x145   :  { %v277_v14 = vadd.f32 %v276_v9, %v209_v8 }
 0x146   :  { %v267_v18 = vpop.f32.mrf.mxu1 }
 0x147   :  { %v268_v20 = vadd.f32 %v267_v18, %v194_v16 }
 0x14c   :  { %v279_v13 = vpop.f32.mrf.mxu3 }
 0x14d   :  { %v280_v15 = vadd.f32 %v279_v13, %v214_v7 }
 0x14f   :  { %361 = vtanh.f32 %v280_v15 }
 0x150   :  { %363 = vtanh.f32 %v277_v14 }
 0x151   :  { %365 = vtanh.f32 %v274_v17 }
 0x152   :  { %367 = vtanh.f32 %v271_v19 }
 0x153   :  { %369 = vtanh.f32 %v268_v20 }
 0x154   :  { %371 = vtanh.f32 %v265_v23 }
 0x155   :  { %v362_v22 = vpop.eup %361  ;;  %373 = vtanh.f32 %v262_v26 }
 0x156   :  { %308 = vmatpush.msrb.mxu2 %v362_v22  ;;  %v364_v25 = vpop.eup %363  ;;  %375 = vtanh.f32 %v259_v29 }
 0x157   :  { %v366_v28 = vpop.eup %365 }
 0x158   :  { %309 = vmatpush.msrb.mxu2 %v364_v25  ;;  %v368_v30 = vpop.eup %367 }
 0x159   :  { %v370_v31 = vpop.eup %369 }
 0x15a   :  { %310 = vmatpush.msrb.mxu2 %v366_v28  ;;  %v372_v32 = vpop.eup %371 }
 0x15b   :  { %v374_v33 = vpop.eup %373 }
 0x15c   :  { %311 = vmatpush.msrb.mxu2 %v368_v30  ;;  %v376_v35 = vpop.eup %375 }
 0x15e   :  { %312 = vmatpush.msrb.mxu2 %v370_v31 }
 0x160   :  { %313 = vmatpush.msrb.mxu2 %v372_v32 }
 0x162   :  { %314 = vmatpush.msrb.mxu2 %v374_v33 }
 0x164   :  { %315 = vmatpush.msrb.mxu2 %v376_v35 }
 0x165   :  { %347 = vmatmul.msk.f32.vlgmr.msrb.gmra.mxu2 %vm216_vm1, %v290_v34 }
 0x1e8   :  { %v317_v37 = vpop.f32.mrf.mxu2 }
 0x1e9   :  { %v318_v38 = vadd.f32 %v317_v37, %v295_v36 }
 0x1eb   :  { %v320_v39 = vmul.f32 0.5, %v318_v38 }
 0x1ed   :  { %377 = vtanh.f32 %v320_v39 }
 0x1f3   :  { %v378_v40 = vpop.eup %377 }
 0x1f4   :  { %v322_v41 = vadd.f32 1.0, %v378_v40 }
 0x1f6   :  { %v323_v42 = vmul.f32 0.5, %v322_v41 }
 0x1f8   :  { %325 = vst.msk [vmem:[%s554_s7] sm:$0xff] %vm324_vm2, %v323_v42 }

</bundles_post_ra>
